<compile_context>
chip_gen: v6e
topology: v6e:2x2x1
jax: 0.10.0
libtpu: 0.0.40
codegen_flags: <defaults>
</compile_context>

<pallas_src>
import functools

import jax
import jax.numpy as jnp
from jax.experimental import pallas as pl
from jax.experimental.pallas import tpu as pltpu


# ---------------------------------------------------------------------------
# Kernel
# ---------------------------------------------------------------------------
def _temporal_block_kernel(*refs, c_in, c_out, l, k, dilation, has_downsample):
    """One batch element: fused conv1+chomp+relu -> conv2+chomp+relu -> residual -> relu."""
    if has_downsample:
        (x_ref, w1_ref, b1_ref, w2_ref, b2_ref, wd_ref, bd_ref,
         o_ref, xpad_ref, hpad_ref) = refs
    else:
        (x_ref, w1_ref, b1_ref, w2_ref, b2_ref,
         o_ref, xpad_ref, hpad_ref) = refs
        wd_ref = bd_ref = None

    p = dilation * (k - 1)               # causal left padding == PyTorch padding
    x = x_ref[0].astype(jnp.float32)     # (C_in, L)

    # ---- conv1 (+ chomp fused away): left-pad x by p zeros inside VMEM ----
    if p > 0:
        xpad_ref[:, :p] = jnp.zeros((c_in, p), jnp.float32)
    xpad_ref[:, p:] = x

    acc1 = jnp.zeros((c_out, l), jnp.float32)
    for j in range(k):                   # k shifted MXU matmuls, f32 accumulation
        acc1 = acc1 + jnp.dot(
            w1_ref[j],                                     # (C_out, C_in)
            xpad_ref[:, j * dilation: j * dilation + l],   # (C_in, L)
            preferred_element_type=jnp.float32,
        )
    h = jnp.maximum(acc1 + b1_ref[...], 0.0)   # ReLU (dropout = identity at inference)

    # ---- conv2 (+ chomp fused away): intermediate h never leaves VMEM ----
    if p > 0:
        hpad_ref[:, :p] = jnp.zeros((c_out, p), jnp.float32)
    hpad_ref[:, p:] = h

    acc2 = jnp.zeros((c_out, l), jnp.float32)
    for j in range(k):
        acc2 = acc2 + jnp.dot(
            w2_ref[j],                                     # (C_out, C_out)
            hpad_ref[:, j * dilation: j * dilation + l],   # (C_out, L)
            preferred_element_type=jnp.float32,
        )
    out_net = jnp.maximum(acc2 + b2_ref[...], 0.0)

    # ---- residual path + final ReLU (VPU epilogue, single store) ----
    if has_downsample:
        res = jnp.dot(wd_ref[...], x, preferred_element_type=jnp.float32) + bd_ref[...]
    else:
        res = x
    o_ref[0] = jnp.maximum(out_net + res, 0.0).astype(o_ref.dtype)


# ---------------------------------------------------------------------------
# Wrapper
# ---------------------------------------------------------------------------
def _apply_weight_norm(v, g):
    """weight_norm (dim=0): w = g * v / ||v||, norm per output channel over (C_in, k)."""
    v = v.astype(jnp.float32)
    norm = jnp.sqrt(jnp.sum(jnp.square(v), axis=(1, 2), keepdims=True))
    return g.astype(jnp.float32).reshape(-1, 1, 1) * v / norm


def temporal_block(x, params, *, kernel_size, stride, dilation, padding, dropout=0.2):
    """Fused Pallas forward of TemporalBlock (inference; dropout is identity)."""
    assert stride == 1, "TemporalBlock/TCN uses stride=1"
    assert padding == dilation * (kernel_size - 1), (
        "residual add requires padding == dilation*(kernel_size-1) (canonical TCN)")
    del dropout  # identity at inference

    n, c_in, l = x.shape
    k, d, p = kernel_size, dilation, padding

    # Fold weight_norm into effective weights (tiny O(C_out*C_in*k) preprocessing).
    w1 = _apply_weight_norm(params["conv1_v"], params["conv1_g"])   # (C_out, C_in, k)
    w2 = _apply_weight_norm(params["conv2_v"], params["conv2_g"])   # (C_out, C_out, k)
    c_out = w1.shape[0]

    # Lay weights out as (k, C_out, C_*): tap index on the leading (cheap) axis,
    # each tap a dense (sublane x lane) slab for the MXU.
    w1_t = jnp.transpose(w1, (2, 0, 1))
    w2_t = jnp.transpose(w2, (2, 0, 1))
    b1 = params["conv1_b"].astype(jnp.float32).reshape(c_out, 1)
    b2 = params["conv2_b"].astype(jnp.float32).reshape(c_out, 1)

    has_downsample = "down_w" in params
    inputs = [x, w1_t, b1, w2_t, b2]
    in_specs = [
        # Last two block dims equal the full array dims -> (8,128) constraint waived.
        pl.BlockSpec((1, c_in, l), lambda b: (b, 0, 0)),
        pl.BlockSpec((k, c_out, c_in), lambda b: (0, 0, 0)),
        pl.BlockSpec((c_out, 1), lambda b: (0, 0)),
        pl.BlockSpec((k, c_out, c_out), lambda b: (0, 0, 0)),
        pl.BlockSpec((c_out, 1), lambda b: (0, 0)),
    ]
    if has_downsample:
        wd = params["down_w"].astype(jnp.float32).reshape(c_out, c_in)
        bd = params["down_b"].astype(jnp.float32).reshape(c_out, 1)
        inputs += [wd, bd]
        in_specs += [
            pl.BlockSpec((c_out, c_in), lambda b: (0, 0)),
            pl.BlockSpec((c_out, 1), lambda b: (0, 0)),
        ]

    kernel = functools.partial(
        _temporal_block_kernel,
        c_in=c_in, c_out=c_out, l=l, k=k, dilation=d,
        has_downsample=has_downsample,
    )

    return pl.pallas_call(
        kernel,
        out_shape=jax.ShapeDtypeStruct((n, c_out, l), x.dtype),
        grid_spec=pltpu.PrefetchScalarGridSpec(
            num_scalar_prefetch=0,
            grid=(n,),
            in_specs=in_specs,
            out_specs=pl.BlockSpec((1, c_out, l), lambda b: (b, 0, 0)),
            scratch_shapes=[
                pltpu.VMEM((c_in, l + p), jnp.float32),    # left-padded input
                pltpu.VMEM((c_out, l + p), jnp.float32),   # left-padded conv1 activation
            ],
        ),
        compiler_params=pltpu.CompilerParams(
            dimension_semantics=("parallel",),
        ),
    )(*inputs)


# ---------------------------------------------------------------------------
# Pure-JAX reference (same math: conv+chomp == causal left-padded conv)
# ---------------------------------------------------------------------------
def _causal_conv_ref(x, w, b, dilation):
    n, c_in, l = x.shape
    c_out, _, k = w.shape
    p = dilation * (k - 1)
    xp = jnp.pad(x.astype(jnp.float32), ((0, 0), (0, 0), (p, 0)))
    out = jnp.broadcast_to(b.astype(jnp.float32)[None, :, None], (n, c_out, l))
    for j in range(k):
        out = out + jnp.einsum(
            "oc,ncl->nol",
            w[:, :, j].astype(jnp.float32),
            xp[:, :, j * dilation: j * dilation + l],
        )
    return out


def temporal_block_ref(x, params, *, kernel_size, dilation):
    w1 = _apply_weight_norm(params["conv1_v"], params["conv1_g"])
    w2 = _apply_weight_norm(params["conv2_v"], params["conv2_g"])
    h = jax.nn.relu(_causal_conv_ref(x, w1, params["conv1_b"], dilation))
    out = jax.nn.relu(_causal_conv_ref(h, w2, params["conv2_b"], dilation))
    if "down_w" in params:
        res = (jnp.einsum("oc,ncl->nol",
                          params["down_w"].astype(jnp.float32),
                          x.astype(jnp.float32))
               + params["down_b"].astype(jnp.float32)[None, :, None])
    else:
        res = x.astype(jnp.float32)
    return jax.nn.relu(out + res).astype(x.dtype)


# ---------------------------------------------------------------------------
# Demo / self-check
# ---------------------------------------------------------------------------
if __name__ == "__main__":
    root = jax.random.PRNGKey(0)

    def make_params(key, c_in, c_out, k, with_down):
        ks = jax.random.split(key, 8)
        params = {
            "conv1_v": 0.01 * jax.random.normal(ks[0], (c_out, c_in, k), jnp.float32),
            "conv1_g": jax.random.uniform(ks[1], (c_out,), jnp.float32, minval=0.5, maxval=1.5),
            "conv1_b": 0.1 * jax.random.normal(ks[2], (c_out,), jnp.float32),
            "conv2_v": 0.01 * jax.random.normal(ks[3], (c_out, c_out, k), jnp.float32),
            "conv2_g": jax.random.uniform(ks[4], (c_out,), jnp.float32, minval=0.5, maxval=1.5),
            "conv2_b": 0.1 * jax.random.normal(ks[5], (c_out,), jnp.float32),
        }
        if with_down:
            params["down_w"] = 0.01 * jax.random.normal(ks[6], (c_out, c_in), jnp.float32)
            params["down_b"] = 0.1 * jax.random.normal(ks[7], (c_out,), jnp.float32)
        return params

    k_a, k_b = jax.random.split(root)

    # Config A: n_inputs != n_outputs -> 1x1 downsample on the residual path.
    N, C_in, C_out, L = 2, 4, 8, 16
    ksz, dil = 3, 2
    pad = dil * (ksz - 1)
    kx, kp = jax.random.split(k_a)
    x = jax.random.normal(kx, (N, C_in, L), jnp.float32)
    params = make_params(kp, C_in, C_out, ksz, with_down=True)
    out = jax.block_until_ready(
        temporal_block(x, params, kernel_size=ksz, stride=1, dilation=dil, padding=pad))
    ref = temporal_block_ref(x, params, kernel_size=ksz, dilation=dil)
    assert out.shape == (N, C_out, L) and out.dtype == x.dtype
    assert bool(jnp.allclose(out, ref, atol=1e-4, rtol=1e-4)), \
        f"max abs diff = {float(jnp.max(jnp.abs(out - ref)))}"

    # Config B: n_inputs == n_outputs -> identity residual.
    N2, C2, L2 = 2, 8, 16
    ksz2, dil2 = 2, 1
    pad2 = dil2 * (ksz2 - 1)
    kx2, kp2 = jax.random.split(k_b)
    x2 = jax.random.normal(kx2, (N2, C2, L2), jnp.float32)
    params2 = make_params(kp2, C2, C2, ksz2, with_down=False)
    out2 = jax.block_until_ready(
        temporal_block(x2, params2, kernel_size=ksz2, stride=1, dilation=dil2, padding=pad2))
    ref2 = temporal_block_ref(x2, params2, kernel_size=ksz2, dilation=dil2)
    assert out2.shape == (N2, C2, L2)
    assert bool(jnp.allclose(out2, ref2, atol=1e-4, rtol=1e-4)), \
        f"max abs diff = {float(jnp.max(jnp.abs(out2 - ref2)))}"

    print("KERNEL_OK")
</pallas_src>

<mosaic_0001>
module attributes {stable_mosaic.version = 11 : i64} {
  func.func @_temporal_block_kernel(%arg0: i32, %arg1: memref<1x4x16xf32, #tpu.memory_space<vmem>>, %arg2: memref<3x8x4xf32, #tpu.memory_space<vmem>>, %arg3: memref<8x1xf32, #tpu.memory_space<vmem>>, %arg4: memref<3x8x8xf32, #tpu.memory_space<vmem>>, %arg5: memref<8x1xf32, #tpu.memory_space<vmem>>, %arg6: memref<8x4xf32, #tpu.memory_space<vmem>>, %arg7: memref<8x1xf32, #tpu.memory_space<vmem>>, %arg8: memref<1x8x16xf32, #tpu.memory_space<vmem>>, %arg9: memref<4x20xf32, #tpu.memory_space<vmem>>, %arg10: memref<8x20xf32, #tpu.memory_space<vmem>>) attributes {dimension_semantics = [#tpu.dimension_semantics<parallel>], iteration_bounds = array<i64: 2>, scalar_prefetch = 0 : i64, scratch_operands = 2 : i64, tpu.core_type = #tpu.core_type<tc>, window_params = [{transform_indices = @transform_0, window_bounds = array<i64: 1, 4, 16>}, {pipeline_mode = #tpu.pipeline_mode<synchronous>, transform_indices = @transform_1, window_bounds = array<i64: 3, 8, 4>}, {pipeline_mode = #tpu.pipeline_mode<synchronous>, transform_indices = @transform_2, window_bounds = array<i64: 8, 1>}, {pipeline_mode = #tpu.pipeline_mode<synchronous>, transform_indices = @transform_3, window_bounds = array<i64: 3, 8, 8>}, {pipeline_mode = #tpu.pipeline_mode<synchronous>, transform_indices = @transform_4, window_bounds = array<i64: 8, 1>}, {pipeline_mode = #tpu.pipeline_mode<synchronous>, transform_indices = @transform_5, window_bounds = array<i64: 8, 4>}, {pipeline_mode = #tpu.pipeline_mode<synchronous>, transform_indices = @transform_6, window_bounds = array<i64: 8, 1>}, {transform_indices = @transform_7, window_bounds = array<i64: 1, 8, 16>}]} {
    %c0 = arith.constant 0 : index
    %c0_0 = arith.constant 0 : index
    %c0_1 = arith.constant 0 : index
    %0 = vector.load %arg1[%c0, %c0_0, %c0_1] : memref<1x4x16xf32, #tpu.memory_space<vmem>>, vector<1x4x16xf32>
    %1 = vector.shape_cast %0 : vector<1x4x16xf32> to vector<4x16xf32>
    %cst = arith.constant 0.000000e+00 : f32
    %2 = vector.broadcast %cst : f32 to vector<4x4xf32>
    %c0_2 = arith.constant 0 : index
    %c0_3 = arith.constant 0 : index
    %3 = vector.load %arg9[%c0_2, %c0_3] : memref<4x20xf32, #tpu.memory_space<vmem>>, vector<4x4xf32>
    tpu.vector_store %arg9[%c0_2, %c0_3], %2 {strides = array<i32>} : memref<4x20xf32, #tpu.memory_space<vmem>>, vector<4x4xf32>,
    %c0_4 = arith.constant 0 : index
    %c4 = arith.constant 4 : index
    %4 = vector.load %arg9[%c0_4, %c4] : memref<4x20xf32, #tpu.memory_space<vmem>>, vector<4x16xf32>
    tpu.vector_store %arg9[%c0_4, %c4], %1 {strides = array<i32>} : memref<4x20xf32, #tpu.memory_space<vmem>>, vector<4x16xf32>,
    %cst_5 = arith.constant 0.000000e+00 : f32
    %5 = vector.broadcast %cst_5 : f32 to vector<8x16xf32>
    %c0_6 = arith.constant 0 : index
    %c0_7 = arith.constant 0 : index
    %c0_8 = arith.constant 0 : index
    %6 = vector.load %arg2[%c0_6, %c0_7, %c0_8] : memref<3x8x4xf32, #tpu.memory_space<vmem>>, vector<1x8x4xf32>
    %7 = vector.shape_cast %6 : vector<1x8x4xf32> to vector<8x4xf32>
    %c0_9 = arith.constant 0 : index
    %c0_10 = arith.constant 0 : index
    %8 = vector.load %arg9[%c0_9, %c0_10] : memref<4x20xf32, #tpu.memory_space<vmem>>, vector<4x16xf32>
    %cst_11 = arith.constant dense<0.000000e+00> : vector<8x16xf32>
    %9 = tpu.matmul %7, %8, %cst_11 {dimension_numbers = #tpu.dot_dimension_numbers<[1], [0], [0], [1], [0, 0, 1, 1], [], []>} : vector<8x4xf32>, vector<4x16xf32>, vector<8x16xf32> -> vector<8x16xf32>
    %10 = arith.addf %5, %9 : vector<8x16xf32>
    %c1 = arith.constant 1 : index
    %c0_12 = arith.constant 0 : index
    %c0_13 = arith.constant 0 : index
    %11 = vector.load %arg2[%c1, %c0_12, %c0_13] : memref<3x8x4xf32, #tpu.memory_space<vmem>>, vector<1x8x4xf32>
    %12 = vector.shape_cast %11 : vector<1x8x4xf32> to vector<8x4xf32>
    %c0_14 = arith.constant 0 : index
    %c2 = arith.constant 2 : index
    %13 = vector.load %arg9[%c0_14, %c2] : memref<4x20xf32, #tpu.memory_space<vmem>>, vector<4x16xf32>
    %cst_15 = arith.constant dense<0.000000e+00> : vector<8x16xf32>
    %14 = tpu.matmul %12, %13, %cst_15 {dimension_numbers = #tpu.dot_dimension_numbers<[1], [0], [0], [1], [0, 0, 1, 1], [], []>} : vector<8x4xf32>, vector<4x16xf32>, vector<8x16xf32> -> vector<8x16xf32>
    %15 = arith.addf %10, %14 : vector<8x16xf32>
    %c2_16 = arith.constant 2 : index
    %c0_17 = arith.constant 0 : index
    %c0_18 = arith.constant 0 : index
    %16 = vector.load %arg2[%c2_16, %c0_17, %c0_18] : memref<3x8x4xf32, #tpu.memory_space<vmem>>, vector<1x8x4xf32>
    %17 = vector.shape_cast %16 : vector<1x8x4xf32> to vector<8x4xf32>
    %c0_19 = arith.constant 0 : index
    %c4_20 = arith.constant 4 : index
    %18 = vector.load %arg9[%c0_19, %c4_20] : memref<4x20xf32, #tpu.memory_space<vmem>>, vector<4x16xf32>
    %cst_21 = arith.constant dense<0.000000e+00> : vector<8x16xf32>
    %19 = tpu.matmul %17, %18, %cst_21 {dimension_numbers = #tpu.dot_dimension_numbers<[1], [0], [0], [1], [0, 0, 1, 1], [], []>} : vector<8x4xf32>, vector<4x16xf32>, vector<8x16xf32> -> vector<8x16xf32>
    %20 = arith.addf %15, %19 : vector<8x16xf32>
    %c0_22 = arith.constant 0 : index
    %c0_23 = arith.constant 0 : index
    %21 = vector.load %arg3[%c0_22, %c0_23] : memref<8x1xf32, #tpu.memory_space<vmem>>, vector<8x1xf32>
    %22 = vector.broadcast %21 : vector<8x1xf32> to vector<8x16xf32>
    %23 = arith.addf %20, %22 : vector<8x16xf32>
    %cst_24 = arith.constant 0.000000e+00 : f32
    %24 = vector.broadcast %cst_24 : f32 to vector<8x16xf32>
    %25 = arith.maximumf %23, %24 : vector<8x16xf32>
    %cst_25 = arith.constant 0.000000e+00 : f32
    %26 = vector.broadcast %cst_25 : f32 to vector<8x4xf32>
    %c0_26 = arith.constant 0 : index
    %c0_27 = arith.constant 0 : index
    %27 = vector.load %arg10[%c0_26, %c0_27] : memref<8x20xf32, #tpu.memory_space<vmem>>, vector<8x4xf32>
    tpu.vector_store %arg10[%c0_26, %c0_27], %26 {strides = array<i32>} : memref<8x20xf32, #tpu.memory_space<vmem>>, vector<8x4xf32>,
    %c0_28 = arith.constant 0 : index
    %c4_29 = arith.constant 4 : index
    %28 = vector.load %arg10[%c0_28, %c4_29] : memref<8x20xf32, #tpu.memory_space<vmem>>, vector<8x16xf32>
    tpu.vector_store %arg10[%c0_28, %c4_29], %25 {strides = array<i32>} : memref<8x20xf32, #tpu.memory_space<vmem>>, vector<8x16xf32>,
    %cst_30 = arith.constant 0.000000e+00 : f32
    %29 = vector.broadcast %cst_30 : f32 to vector<8x16xf32>
    %c0_31 = arith.constant 0 : index
    %c0_32 = arith.constant 0 : index
    %c0_33 = arith.constant 0 : index
    %30 = vector.load %arg4[%c0_31, %c0_32, %c0_33] : memref<3x8x8xf32, #tpu.memory_space<vmem>>, vector<1x8x8xf32>
    %31 = vector.shape_cast %30 : vector<1x8x8xf32> to vector<8x8xf32>
    %c0_34 = arith.constant 0 : index
    %c0_35 = arith.constant 0 : index
    %32 = vector.load %arg10[%c0_34, %c0_35] : memref<8x20xf32, #tpu.memory_space<vmem>>, vector<8x16xf32>
    %cst_36 = arith.constant dense<0.000000e+00> : vector<8x16xf32>
    %33 = tpu.matmul %31, %32, %cst_36 {dimension_numbers = #tpu.dot_dimension_numbers<[1], [0], [0], [1], [0, 0, 1, 1], [], []>} : vector<8x8xf32>, vector<8x16xf32>, vector<8x16xf32> -> vector<8x16xf32>
    %34 = arith.addf %29, %33 : vector<8x16xf32>
    %c1_37 = arith.constant 1 : index
    %c0_38 = arith.constant 0 : index
    %c0_39 = arith.constant 0 : index
    %35 = vector.load %arg4[%c1_37, %c0_38, %c0_39] : memref<3x8x8xf32, #tpu.memory_space<vmem>>, vector<1x8x8xf32>
    %36 = vector.shape_cast %35 : vector<1x8x8xf32> to vector<8x8xf32>
    %c0_40 = arith.constant 0 : index
    %c2_41 = arith.constant 2 : index
    %37 = vector.load %arg10[%c0_40, %c2_41] : memref<8x20xf32, #tpu.memory_space<vmem>>, vector<8x16xf32>
    %cst_42 = arith.constant dense<0.000000e+00> : vector<8x16xf32>
    %38 = tpu.matmul %36, %37, %cst_42 {dimension_numbers = #tpu.dot_dimension_numbers<[1], [0], [0], [1], [0, 0, 1, 1], [], []>} : vector<8x8xf32>, vector<8x16xf32>, vector<8x16xf32> -> vector<8x16xf32>
    %39 = arith.addf %34, %38 : vector<8x16xf32>
    %c2_43 = arith.constant 2 : index
    %c0_44 = arith.constant 0 : index
    %c0_45 = arith.constant 0 : index
    %40 = vector.load %arg4[%c2_43, %c0_44, %c0_45] : memref<3x8x8xf32, #tpu.memory_space<vmem>>, vector<1x8x8xf32>
    %41 = vector.shape_cast %40 : vector<1x8x8xf32> to vector<8x8xf32>
    %c0_46 = arith.constant 0 : index
    %c4_47 = arith.constant 4 : index
    %42 = vector.load %arg10[%c0_46, %c4_47] : memref<8x20xf32, #tpu.memory_space<vmem>>, vector<8x16xf32>
    %cst_48 = arith.constant dense<0.000000e+00> : vector<8x16xf32>
    %43 = tpu.matmul %41, %42, %cst_48 {dimension_numbers = #tpu.dot_dimension_numbers<[1], [0], [0], [1], [0, 0, 1, 1], [], []>} : vector<8x8xf32>, vector<8x16xf32>, vector<8x16xf32> -> vector<8x16xf32>
    %44 = arith.addf %39, %43 : vector<8x16xf32>
    %c0_49 = arith.constant 0 : index
    %c0_50 = arith.constant 0 : index
    %45 = vector.load %arg5[%c0_49, %c0_50] : memref<8x1xf32, #tpu.memory_space<vmem>>, vector<8x1xf32>
    %46 = vector.broadcast %45 : vector<8x1xf32> to vector<8x16xf32>
    %47 = arith.addf %44, %46 : vector<8x16xf32>
    %cst_51 = arith.constant 0.000000e+00 : f32
    %48 = vector.broadcast %cst_51 : f32 to vector<8x16xf32>
    %49 = arith.maximumf %47, %48 : vector<8x16xf32>
    %c0_52 = arith.constant 0 : index
    %c0_53 = arith.constant 0 : index
    %50 = vector.load %arg6[%c0_52, %c0_53] : memref<8x4xf32, #tpu.memory_space<vmem>>, vector<8x4xf32>
    %cst_54 = arith.constant dense<0.000000e+00> : vector<8x16xf32>
    %51 = tpu.matmul %50, %1, %cst_54 {dimension_numbers = #tpu.dot_dimension_numbers<[1], [0], [0], [1], [0, 0, 1, 1], [], []>} : vector<8x4xf32>, vector<4x16xf32>, vector<8x16xf32> -> vector<8x16xf32>
    %c0_55 = arith.constant 0 : index
    %c0_56 = arith.constant 0 : index
    %52 = vector.load %arg7[%c0_55, %c0_56] : memref<8x1xf32, #tpu.memory_space<vmem>>, vector<8x1xf32>
    %53 = vector.broadcast %52 : vector<8x1xf32> to vector<8x16xf32>
    %54 = arith.addf %51, %53 : vector<8x16xf32>
    %55 = arith.addf %49, %54 : vector<8x16xf32>
    %cst_57 = arith.constant 0.000000e+00 : f32
    %56 = vector.broadcast %cst_57 : f32 to vector<8x16xf32>
    %57 = arith.maximumf %55, %56 : vector<8x16xf32>
    %c0_58 = arith.constant 0 : index
    %c0_59 = arith.constant 0 : index
    %c0_60 = arith.constant 0 : index
    %58 = vector.load %arg8[%c0_58, %c0_59, %c0_60] : memref<1x8x16xf32, #tpu.memory_space<vmem>>, vector<1x8x16xf32>
    %59 = vector.shape_cast %58 : vector<1x8x16xf32> to vector<8x16xf32>
    %60 = vector.shape_cast %57 : vector<8x16xf32> to vector<1x8x16xf32>
    tpu.vector_store %arg8[%c0_58, %c0_59, %c0_60], %60 {strides = array<i32>} : memref<1x8x16xf32, #tpu.memory_space<vmem>>, vector<1x8x16xf32>,
    return
  }
  func.func @transform_0(%arg0: i32) -> (i32, i32, i32) {
    %c0_i32 = arith.constant 0 : i32
    %c0_i32_0 = arith.constant 0 : i32
    %c0_i32_1 = arith.constant 0 : i32
    return %arg0, %c0_i32, %c0_i32_0 : i32, i32, i32
  }
  func.func @transform_1(%arg0: i32) -> (i32, i32, i32) {
    %c0_i32 = arith.constant 0 : i32
    %c0_i32_0 = arith.constant 0 : i32
    %c0_i32_1 = arith.constant 0 : i32
    %c0_i32_2 = arith.constant 0 : i32
    return %c0_i32, %c0_i32_0, %c0_i32_1 : i32, i32, i32
  }
  func.func @transform_2(%arg0: i32) -> (i32, i32) {
    %c0_i32 = arith.constant 0 : i32
    %c0_i32_0 = arith.constant 0 : i32
    %c0_i32_1 = arith.constant 0 : i32
    return %c0_i32, %c0_i32_0 : i32, i32
  }
  func.func @transform_3(%arg0: i32) -> (i32, i32, i32) {
    %c0_i32 = arith.constant 0 : i32
    %c0_i32_0 = arith.constant 0 : i32
    %c0_i32_1 = arith.constant 0 : i32
    %c0_i32_2 = arith.constant 0 : i32
    return %c0_i32, %c0_i32_0, %c0_i32_1 : i32, i32, i32
  }
  func.func @transform_4(%arg0: i32) -> (i32, i32) {
    %c0_i32 = arith.constant 0 : i32
    %c0_i32_0 = arith.constant 0 : i32
    %c0_i32_1 = arith.constant 0 : i32
    return %c0_i32, %c0_i32_0 : i32, i32
  }
  func.func @transform_5(%arg0: i32) -> (i32, i32) {
    %c0_i32 = arith.constant 0 : i32
    %c0_i32_0 = arith.constant 0 : i32
    %c0_i32_1 = arith.constant 0 : i32
    return %c0_i32, %c0_i32_0 : i32, i32
  }
  func.func @transform_6(%arg0: i32) -> (i32, i32) {
    %c0_i32 = arith.constant 0 : i32
    %c0_i32_0 = arith.constant 0 : i32
    %c0_i32_1 = arith.constant 0 : i32
    return %c0_i32, %c0_i32_0 : i32, i32
  }
  func.func @transform_7(%arg0: i32) -> (i32, i32, i32) {
    %c0_i32 = arith.constant 0 : i32
    %c0_i32_0 = arith.constant 0 : i32
    %c0_i32_1 = arith.constant 0 : i32
    return %arg0, %c0_i32, %c0_i32_0 : i32, i32, i32
  }
}

</mosaic_0001>

<bundles_post_ra>
// kernel: tpu_custom_call.1
= control target key start
LH: loop header
LB: loop body
LE: loop exit
PB: predicated region body
PF: predicated region fallthrough
CT: control target
= control target key end

     0   :  { %12 = vsyncpa [#allocation5], 0  ;;  %s1330_s0 = inlined_call_operand.vmem [shape: f32[2,4,16], index: 0, kind: input, shape index: {}]   ;;  %s1331_s1 = inlined_call_operand.vmem [shape: f32[3,8,4], index: 1, kind: input, shape index: {}]   ;;  %s1332_s2 = inlined_call_operand.vmem [shape: f32[8,1], index: 2, kind: input, shape index: {}]   ;;  %s1333_s3 = inlined_call_operand.vmem [shape: f32[3,8,8], index: 3, kind: input, shape index: {}]   ;;  %s1334_s4 = inlined_call_operand.vmem [shape: f32[8,1], index: 4, kind: input, shape index: {}]   ;;  %s1335_s5 = inlined_call_operand.vmem [shape: f32[8,4], index: 5, kind: input, shape index: {}]   ;;  %s1336_s6 = inlined_call_operand.vmem [shape: f32[8,1], index: 6, kind: input, shape index: {}]   ;;  %s1337_s7 = inlined_call_operand.hbm [shape: f32[2,8,16], index: 7, kind: output, shape index: {}]  }
   0x1   :  { %14 = vsyncpa [#allocation5 + $0x1], 0  ;;  %s1168_s24 = smov 0   ;;  %s1170_s25 = smov 0  }
   0x2   :  { %s1172_s26 = smov 0   ;;  %s1174_s27 = smov 0  }
   0x3 LB: > { %s1189_s28 = sadd.s32 4294967295, %s1119_s27   ;;  %s938_s29 = sadd.s32 4294967294, %s1119_s27   ;;  %s1119_s27 = sphi %s1174_s27, %s1343_s27   ;;  %s1115_s26 = sphi %s1172_s26, %s1342_s26   ;;  %s1111_s25 = sphi %s1170_s25, %s1341_s25   ;;  %s1107_s24 = sphi %s1168_s24, %s1340_s24  }
   0x4   : > { %s1193_s30 = sadd.s32 1, %s1119_s27   ;;  %s179_s8 = sadd.s32 1, %s1115_s26 }
   0x5   : > { %s176_s9 = ssub.s32 %s1119_s27, %s1193_s30  ;;  %p189_p0 = scmp.ne.s32.totalorder %s1115_s26, %s1111_s25 }
   0x6   : > { %p177_p1 = scmp.eq.s32.totalorder %s176_s9, 0  ;;  %p190_p2 = scmp.eq.s32.totalorder %s1189_s28, 1 }
   0x7   : > { %p195_p3 = scmp.ne.s32.totalorder %s1111_s25, %s1107_s24  ;;  %p196_p4 = scmp.eq.s32.totalorder %s938_s29, 1 }
   0x8   : > { %s1204_s10 = scalar_select %p177_p1, %s1115_s26, %s179_s8  }
   0x9   : > { %p1206_p5 = por %p190_p2, %p189_p0  ;;  %p1210_p6 = por %p196_p4, %p195_p3 }
   0xa   : > { %p941_p7 = scmp.ge.s32.totalorder %s1119_s27, 1  ;;  %p239_p8 = scmp.lt.s32.totalorder %s1119_s27, 3 }
   0xc   : > { %p240_p9 = pnand %p941_p7, %p239_p8 }
   0xd   : > { %p270_p10 = scmp.lt.s32.totalorder (!%p240_p9), %s1189_s28, 1  ;;  %s1122_s18 = smov (!%p240_p9), 4  }
   0xe   : > { %243 = sbr.rel (%p240_p9) target bundleno = 925 (0x39d), region = 48  ;;  %s1125_s21 = smov (!%p240_p9), 124  }
   0xf   : > { %s1126_s22 = smov (!%p240_p9), 126   ;;  %s960_s15 = sshll.u32 (!%p240_p9), %s1189_s28, 7 }
  0x10   : > { %s1127_s23 = smov (!%p240_p9), [#allocation4]  }
  0x11   : > { %s1063_s29 = sshll.u32 (!%p240_p9), %s1127_s23, 4  ;;  %s1064_s29 = int_to_ptr.vmem [resolvable:$false] %s1063_s29 }
  0x13   : > { %vm275_vm0 = vcmask 27648   ;;  %v1121_v0 = vmov 0.0   ;;  %s271_s13 = scalar_select %p270_p10, %s1189_s28, 1  ;;  %vm290_vm1 = vcmask 31744   ;;  %vm1123_vm2 = vmmov 0   ;;  %v283_v5 = vld [vmem:[%s1331_s1] sm:$0xff] }
  0x14   : > { %276 = vst.msk [vmem:[#allocation2] sm:$0xf] %vm275_vm0, %v1121_v0  ;;  %982 = vmatprep.subr.mxu1 %v1121_v0  ;;  %977 = vmatprep.subr.mxu0 %v1121_v0  ;;  %vm281_vm3 = vcmask 158752   ;;  %v1124_v3 = vmov 0   ;;  %vm294_vm4 = vcmask 1043456   ;;  %v522_v6 = vld [vmem:[%s1332_s2] sm:$0xff] }
  0x15   : > { %s943_s14 = sshll.u32 %s271_s13, 2  ;;  %979 = vmatprep.mubr.msk.f32.mxu0 %vm1123_vm2, %v1121_v0  ;;  %984 = vmatprep.mubr.msk.f32.mxu1 %vm1123_vm2, %v1121_v0  ;;  %530 = vst.msk [vmem:[#allocation3] sm:$0xff] %vm290_vm1, %v1121_v0  ;;  %v944_v7 = vld [vmem:[%s1331_s1 + $0x8] sm:$0xff]  ;;  %v949_v10 = vld [vmem:[%s1331_s1 + $0x10] sm:$0xff]  ;;  %vm535_vm5 = vcmask 162848   ;;  %vm545_vm6 = vcmask 64512  }
  0x16   : > { %s273_s17 = scalar_lea.vmem %s1330_s0, %s943_s14  ;;  %1057 = vset.pattern.permute.xlu1 %v1124_v3  ;;  %1058 = vset.pattern.permute.xlu0 %v1124_v3  ;;  %v537_v24 = vld [vmem:[%s1333_s3] sm:$0xff]  ;;  %v952_v28 = vld [vmem:[%s1333_s3 + $0x8] sm:$0xff]  ;;  %v955_v31 = vld [vmem:[%s1333_s3 + $0x10] sm:$0xff]  ;;  %s267_s13 = sand.u32 1, %s1111_s25   ;;  %vm863_vm7 = vcmask 130048  }
  0x17   : > { %v1224_v1 = vld [vmem:[%s273_s17] sm:$0xf]  ;;  %s942_s14 = sshll.u32 %s267_s13, 3  ;;  %s1065_s28 = scalar_lea.vmem %s1064_s29, 256 }
  0x18   : > { %278 = vrot.lane.b32.xlu0 %v1224_v1, %s1122_s18  ;;  %v771_v25 = vld [vmem:[%s1334_s4] sm:$0xff]  ;;  %s269_s16 = scalar_lea.vmem [#allocation4], %s942_s14 }
  0x19   : > { %v780_v26 = vld [vmem:[%s1336_s6] sm:$0xff]  ;;  %s879_s17 = sshll.u32 %s269_s16, 4  ;;  %s880_s17 = int_to_ptr.vmem [resolvable:$true] %s879_s17 }
  0x1a   : > { %v779_v27 = vld [vmem:[%s1335_s5] sm:$0xff]  ;;  %p1066_p0 = scmp.lt.s32.totalorder %s880_s17, %s1064_s29 }
  0x8a   : > { %v279_v2 = vpop.permute.xlu0 %278 }
  0x8b   : > { %282 = vst.msk [vmem:[#allocation2] sm:$0xf] %vm281_vm3, %v279_v2 }
  0x92   : > { %v284_v4 = vld [vmem:[#allocation2] sm:$0xf] }
  0x93   : > { %444 = vrot.lane.b32.xlu1 %v284_v4, %s1125_s21  ;;  %288 = vrot.lane.b32.xlu0 %v284_v4, %s1126_s22 }
  0x94   : > { %983 = vmatpush3.msk.msra.mxu1 %vm294_vm4, %v284_v4 }
  0x95   : > { %985 = vmatmul.mubr.msk.f32.vlgmr.msra.gmra.mxu1 %vm290_vm1, %v283_v5  ;;  %992 = vmatprep.subr.mxu1 %v1121_v0 }
  0x96   : > { %994 = vmatprep.mubr.msk.f32.mxu1 %vm1123_vm2, %v1121_v0 }
  0x97   : > { %525 = vperm.xlu1 %1057, %v522_v6  }
 0x105   : > { %v289_v8 = vpop.permute.xlu0 %288  ;;  %v445_v9 = vpop.permute.xlu1 %444 }
 0x106   : > { %978 = vmatpush3.msk.msra.mxu0 %vm294_vm4, %v289_v8 }
 0x107   : > { %980 = vmatmul.mubr.msk.f32.vlgmr.msra.gmra.mxu0 %vm290_vm1, %v944_v7  ;;  %987 = vmatprep.subr.mxu0 %v1121_v0 }
 0x108   : > { %988 = vmatpush3.msk.msra.mxu0 %vm294_vm4, %v445_v9  ;;  %989 = vmatprep.mubr.msk.f32.mxu0 %vm1123_vm2, %v1121_v0 }
 0x109   : > { %997 = vmatprep.subr.mxu0 %v1121_v0 }
 0x10b   : > { %990 = vmatmul.mubr.msk.f32.vlgmr.msra.gmra.mxu0 %vm290_vm1, %v949_v10 }
 0x10c   : > { %999 = vmatprep.mubr.msk.f32.mxu0 %vm1123_vm2, %v1121_v0 }
 0x112   : > { %v526_v17 = vpop.permute.xlu1 %525 }
 0x155   : > { %v438_v11 = vpop.f32.mrf.mxu1 }
 0x157   : > { %v986_v12 = vpop.f32.mrf.mxu1 }
 0x1c7   : > { %v363_v13 = vpop.f32.mrf.mxu0 }
 0x1c8   : > { %v439_v15 = vadd.f32 %v438_v11, %v363_v13 }
 0x1c9   : > { %v981_v14 = vpop.f32.mrf.mxu0 }
 0x1cb   : > { %v517_v16 = vpop.f32.mrf.mxu0 }
 0x1cc   : > { %v521_v18 = vadd.f32 %v517_v16, %v439_v15 }
 0x1cd   : > { %v991_v19 = vpop.f32.mrf.mxu0 }
 0x1ce   : > { %v528_v20 = vadd.f32 %v526_v17, %v521_v18 }
 0x1d0   : > { %v529_v21 = vmax.f32 %v528_v20, 0.0 }
 0x1d2   : > { %532 = vrot.lane.b32.xlu0 %v529_v21, %s1122_s18  ;;  %s877_s18 = scalar_lea.hbm %s1337_s7, %s960_s15 }
 0x244   : > { %v533_v22 = vpop.permute.xlu0 %532 }
 0x245   : > { %536 = vst.msk [vmem:[#allocation3] sm:$0xff] %vm535_vm5, %v533_v22 }
 0x24c   : > { %v538_v23 = vld [vmem:[#allocation3] sm:$0xff] }
 0x24d   : > { %694 = vrot.lane.b32.xlu0 %v538_v23, %s1125_s21  ;;  %542 = vrot.lane.b32.xlu1 %v538_v23, %s1126_s22  ;;  %s866_s21 = scalar_lea.sflag [#allocation5], %s267_s13  ;;  %s1059_s22 = scalar_lea.vmem %s880_s17, 128 }
 0x24e   : > { %998 = vmatpush3.msra.mxu0 %v538_v23  ;;  %p1060_p11 = scmp.ne.s32.totalorder %s880_s17, %s1059_s22  ;;  %p1067_p1 = scmp.lt.s32.totalorder %s1065_s28, %s1059_s22 }
 0x24f   : > { %1000 = vmatmul.mubr.msk.f32.vlgmr.msra.gmra.mxu0 %vm545_vm6, %v537_v24  ;;  %1007 = vmatprep.subr.mxu0 %v1121_v0 }
 0x250   : > { %1008 = vmatpush3.msk.msra.mxu0 %vm294_vm4, %v1224_v1  ;;  %1009 = vmatprep.mubr.msk.f32.mxu0 %vm1123_vm2, %v1121_v0  ;;  %p1061_p12 = pnand %p1060_p11, %p1206_p5  ;;  %p1068_p2 = por %p1067_p1, %p1066_p0 }
 0x251   : > { %774 = vperm.xlu1 %1057, %v771_v25   ;;  %783 = vperm.xlu0 %1058, %v780_v26  }
 0x252   : > { %p1062_p13 = pneg %p1061_p12 }
 0x253   : > { %1010 = vmatmul.mubr.msk.f32.vlgmr.msra.gmra.mxu0 %vm290_vm1, %v779_v27 }
 0x254   : > { %p1069_p3 = pnand %p1068_p2, %p1062_p13 }
 0x2bf   : > { %v543_v29 = vpop.permute.xlu1 %542  ;;  %v695_v30 = vpop.permute.xlu0 %694 }
 0x2c0   : > { %993 = vmatpush3.msra.mxu1 %v543_v29 }
 0x2c1   : > { %995 = vmatmul.mubr.msk.f32.vlgmr.msra.gmra.mxu1 %vm545_vm6, %v952_v28  ;;  %1002 = vmatprep.subr.mxu1 %v1121_v0 }
 0x2c2   : > { %1003 = vmatpush3.msra.mxu1 %v695_v30  ;;  %1004 = vmatprep.mubr.msk.f32.mxu1 %vm1123_vm2, %v1121_v0 }
 0x2c5   : > { %1005 = vmatmul.mubr.msk.f32.vlgmr.msra.gmra.mxu1 %vm545_vm6, %v955_v31 }
 0x2cc   : > { %v784_v40 = vpop.permute.xlu0 %783  ;;  %v775_v42 = vpop.permute.xlu1 %774 }
 0x30f   : > { %v688_v32 = vpop.f32.mrf.mxu0 }
 0x311   : > { %v1001_v33 = vpop.f32.mrf.mxu0 }
 0x313   : > { %v857_v34 = vpop.f32.mrf.mxu0 }
 0x314   : > { %v858_v45 = vadd.f32 %v857_v34, %v784_v40 }
 0x315   : > { %v1011_v35 = vpop.f32.mrf.mxu0 }
 0x381   : > { %v615_v36 = vpop.f32.mrf.mxu1 }
 0x382   : > { %v689_v38 = vadd.f32 %v688_v32, %v615_v36 }
 0x383   : > { %v996_v37 = vpop.f32.mrf.mxu1 }
 0x385   : > { %v766_v39 = vpop.f32.mrf.mxu1 }
 0x386   : > { %v770_v41 = vadd.f32 %v766_v39, %v689_v38 }
 0x387   : > { %v1006_v43 = vpop.f32.mrf.mxu1 }
 0x388   : > { %v777_v44 = vadd.f32 %v775_v42, %v770_v41 }
 0x38a   : > { %v778_v46 = vmax.f32 %v777_v44, 0.0 }
 0x38c   : > { %v861_v47 = vadd.f32 %v858_v45, %v778_v46 }
 0x38e   : > { %v862_v48 = vmax.f32 %v861_v47, 0.0 }
 0x390   : > { %864 = vst.msk [vmem:[%s269_s16] sm:$0xff] %vm863_vm7, %v862_v48 }
 0x391   : > { %1072 = shalt.err (!%p1069_p3)
}
 0x392   : > { %s1073_s8 = scalar_lea.hbm %s877_s18, 128  ;;  %s1077_s14 = scalar_lea.hbm %s1337_s7, 256 }
 0x393   : > { %p1074_p4 = scmp.ne.s32.totalorder %s877_s18, %s1073_s8  ;;  %p1078_p9 = scmp.lt.s32.totalorder %s877_s18, %s1337_s7 }
 0x394   : > { %p1079_p10 = scmp.lt.s32.totalorder %s1077_s14, %s1073_s8 }
 0x395   : > { %p1075_p7 = pnand %p1074_p4, %p1206_p5 }
 0x396   : > { %p1080_p11 = por %p1079_p10, %p1078_p9 }
 0x397   : > { %p1076_p8 = pneg %p1075_p7 }
 0x399   : > { %p1081_p12 = pnand %p1080_p11, %p1076_p8 }
 0x39b   : > { %1084 = shalt.err (!%p1081_p12)
}
 0x39c   : > { %1012 = dma.vmem_to_hbm [thread:$0]  (%p1206_p5), %s880_s17, 128, %s877_s18, %s866_s21  }
 0x39d PF: > { %p1018_p13 = scmp.ge.s32.totalorder %s1119_s27, 2  ;;  %s891_s19 = sand.u32 1, %s1107_s24  }
 0x39e   : > { %s892_s20 = scalar_lea.sflag [#allocation5], %s891_s19 }
 0x39f   : > { %p1015_p0 = pnand %p1018_p13, %p1210_p6 }
 0x3a1   : > { %p1016_p1 = pneg %p1015_p0 }
 0x3a3   : > { %1102 = dma.done.wait (%p1016_p1), %s892_s20, 128  }
 0x3a4   : > { %1104 = vsyncadd (%p1016_p1), %s892_s20, 4294967168  ;;  %p17_p2 = scmp.ge.s32.totalorder %s1193_s30, 4   ;;  %s1340_s24 = smov %s1111_s25 }
 0x3a5   : > { %s1341_s25 = smov %s1115_s26  ;;  %s1342_s26 = smov %s1204_s10 }
 0x3a6   : > { %s1343_s27 = smov %s1193_s30  ;;  %19 = sbr.rel (!%p17_p2) target bundleno = 3 (0x3), region = 87 }
 0x3ab   :  { %897 = vsyncpa [#allocation5], 1 }
 0x3ac   :  { %899 = vsyncpa [#allocation5 + $0x1], 1 }

</bundles_post_ra>
